<compile_context>
chip_gen: v6e
topology: v6e:2x2x1
jax: 0.10.0
libtpu: 0.0.40
codegen_flags: <defaults>
</compile_context>

<pallas_src>
import functools
import math

import jax
import jax.numpy as jnp
import numpy as np
from jax.experimental import pallas as pl
from jax.experimental.pallas import tpu as pltpu


def _mf_forward_kernel(inv_temp, ids_ref, u_tbl_ref, i_tbl_ref, o_ref):
    """One grid step computes a full (TB, N) score tile.

    ids_ref   : (TB, 1+N) int32   user id in col 0, item ids in cols 1..N
    u_tbl_ref : (U, D)  float32   full user-embedding table (resident in VMEM)
    i_tbl_ref : (I, D)  float32   full item-embedding table (resident in VMEM)
    o_ref     : (TB, N) float32   output scores tile
    """
    ids = ids_ref[...]
    u_tbl = u_tbl_ref[...]
    i_tbl = i_tbl_ref[...]

    TB, W = ids.shape
    N = W - 1
    U, D = u_tbl.shape
    I = i_tbl.shape[0]

    # --- Gather user rows: u_g[b, :] = u_tbl[ids[b, 0], :] (one-hot select-sum) ---
    uid = ids[:, 0:1]                                                # (TB, 1)
    u_oh = (jax.lax.broadcasted_iota(jnp.int32, (TB, U), 1)
            == uid).astype(jnp.float32)                              # (TB, U)
    u_g = jnp.sum(u_oh[:, :, None] * u_tbl[None, :, :], axis=1)      # (TB, D)

    # --- Lane-dense scores against the whole item table: s_all (TB, I) ---
    # s_all[b, i] = <u_g[b, :], i_tbl[i, :]>  (f32 VPU mul + XLU reduce).
    # TODO(synk): for production-sized D/I, lower this to an MXU matmul
    #             (jnp.dot(u_g, i_tbl.T, preferred_element_type=jnp.float32)).
    s_all = jnp.sum(u_g[:, None, :] * i_tbl[None, :, :], axis=-1)    # (TB, I)

    # --- Pick the requested item columns: scores[b, n] = s_all[b, ids[b, 1+n]] ---
    iid = ids[:, 1:]                                                 # (TB, N)
    sel = (jax.lax.broadcasted_iota(jnp.int32, (TB, N, I), 2)
           == iid[:, :, None]).astype(jnp.float32)                   # (TB, N, I)
    scores = jnp.sum(sel * s_all[:, None, :], axis=-1)               # (TB, N)

    o_ref[...] = (scores * inv_temp).astype(o_ref.dtype)


def mf_forward(batch, user_emb, item_emb, temperature, *, tile_b=8):
    """batch: (B, 1+N) int; user_emb: (U, D) f32; item_emb: (I, D) f32 -> (B, N) f32."""
    batch = batch.astype(jnp.int32)
    B, W = batch.shape
    N = W - 1
    U, D = user_emb.shape
    I, _ = item_emb.shape

    # Batch tile: a single full tile if B is small, otherwise TB rows per step.
    if B <= tile_b:
        TB, B_pad = B, B
    else:
        TB = tile_b
        assert TB % 8 == 0, "sub-array batch tiles must respect the (8, 128) rule"
        B_pad = ((B + TB - 1) // TB) * TB

    if B_pad != B:
        # Pad with id 0 (a valid row); padded scores are sliced off below.
        batch = jnp.pad(batch, ((0, B_pad - B), (0, 0)))

    kernel = functools.partial(_mf_forward_kernel, float(1.0 / temperature))

    out = pl.pallas_call(
        kernel,
        grid=(B_pad // TB,),
        in_specs=[
            pl.BlockSpec((TB, W), lambda t: (t, 0)),   # id tile for this batch slab
            pl.BlockSpec((U, D), lambda t: (0, 0)),    # full user table, fetched once
            pl.BlockSpec((I, D), lambda t: (0, 0)),    # full item table, fetched once
        ],
        out_specs=pl.BlockSpec((TB, N), lambda t: (t, 0)),
        out_shape=jax.ShapeDtypeStruct((B_pad, N), jnp.float32),
        compiler_params=pltpu.CompilerParams(
            dimension_semantics=("parallel",)),        # batch tiles split across TCs
    )(batch, user_emb, item_emb)

    return out[:B]


if __name__ == "__main__":
    key = jax.random.PRNGKey(0)

    # Small, deterministic synthetic problem (arg.dim = 32, arg.temperature = 0.1).
    num_users, num_items, dim = 32, 64, 32
    B, N = 8, 8
    temperature = 0.1

    k_u, k_i, k_uid, k_iid = jax.random.split(key, 4)

    # nn.init.xavier_normal_: std = sqrt(2 / (fan_in + fan_out))
    std_u = math.sqrt(2.0 / (num_users + dim))
    std_i = math.sqrt(2.0 / (num_items + dim))
    user_emb = (std_u * jax.random.normal(k_u, (num_users, dim))).astype(jnp.float32)
    item_emb = (std_i * jax.random.normal(k_i, (num_items, dim))).astype(jnp.float32)

    user_ids = jax.random.randint(k_uid, (B, 1), 0, num_users)
    item_ids = jax.random.randint(k_iid, (B, N), 0, num_items)
    batch = jnp.concatenate([user_ids, item_ids], axis=1).astype(jnp.int32)

    scores = mf_forward(batch, user_emb, item_emb, temperature)
    scores = jax.block_until_ready(scores)

    # Pure-JAX reference of the PyTorch forward.
    u_ref = user_emb[batch[:, 0:1]]     # (B, 1, D)
    i_ref = item_emb[batch[:, 1:]]      # (B, N, D)
    ref = jnp.sum(u_ref * i_ref, axis=-1) / temperature

    assert scores.shape == (B, N) and scores.dtype == jnp.float32
    assert np.allclose(np.asarray(scores), np.asarray(ref), rtol=1e-5, atol=1e-5)
    print("KERNEL_OK")
</pallas_src>

<mosaic_0001>
module attributes {stable_mosaic.version = 11 : i64} {
  func.func @_mf_forward_kernel(%arg0: i32, %arg1: memref<8x9xi32, #tpu.memory_space<vmem>>, %arg2: memref<32x32xf32, #tpu.memory_space<vmem>>, %arg3: memref<64x32xf32, #tpu.memory_space<vmem>>, %arg4: memref<8x8xf32, #tpu.memory_space<vmem>>) attributes {dimension_semantics = [#tpu.dimension_semantics<parallel>], iteration_bounds = array<i64: 1>, scalar_prefetch = 0 : i64, scratch_operands = 0 : i64, tpu.core_type = #tpu.core_type<tc>, window_params = [{transform_indices = @transform_0, window_bounds = array<i64: 8, 9>}, {pipeline_mode = #tpu.pipeline_mode<synchronous>, transform_indices = @transform_1, window_bounds = array<i64: 32, 32>}, {pipeline_mode = #tpu.pipeline_mode<synchronous>, transform_indices = @transform_2, window_bounds = array<i64: 64, 32>}, {transform_indices = @transform_3, window_bounds = array<i64: 8, 8>}]} {
    %c0 = arith.constant 0 : index
    %c0_0 = arith.constant 0 : index
    %0 = vector.load %arg1[%c0, %c0_0] : memref<8x9xi32, #tpu.memory_space<vmem>>, vector<8x9xi32>
    %c0_1 = arith.constant 0 : index
    %c0_2 = arith.constant 0 : index
    %1 = vector.load %arg2[%c0_1, %c0_2] : memref<32x32xf32, #tpu.memory_space<vmem>>, vector<32x32xf32>
    %c0_3 = arith.constant 0 : index
    %c0_4 = arith.constant 0 : index
    %2 = vector.load %arg3[%c0_3, %c0_4] : memref<64x32xf32, #tpu.memory_space<vmem>>, vector<64x32xf32>
    %3 = vector.extract_strided_slice %0 {offsets = [0, 0], sizes = [8, 1], strides = [1, 1]} : vector<8x9xi32> to vector<8x1xi32>
    %4 = tpu.iota {dimensions = array<i32: 1>} : vector<8x32xi32>
    %5 = vector.broadcast %3 : vector<8x1xi32> to vector<8x32xi32>
    %6 = arith.cmpi eq, %4, %5 : vector<8x32xi32>
    %7 = arith.extui %6 : vector<8x32xi1> to vector<8x32xi32>
    %8 = arith.sitofp %7 : vector<8x32xi32> to vector<8x32xf32>
    %9 = vector.shape_cast %8 : vector<8x32xf32> to vector<8x32x1xf32>
    %10 = vector.shape_cast %1 : vector<32x32xf32> to vector<1x32x32xf32>
    %11 = vector.broadcast %9 : vector<8x32x1xf32> to vector<8x32x32xf32>
    %12 = vector.broadcast %10 : vector<1x32x32xf32> to vector<8x32x32xf32>
    %13 = arith.mulf %11, %12 : vector<8x32x32xf32>
    %cst = arith.constant dense<0.000000e+00> : vector<8x32xf32>
    %14 = vector.multi_reduction <add>, %13, %cst [1] : vector<8x32x32xf32> to vector<8x32xf32>
    %15 = vector.shape_cast %14 : vector<8x32xf32> to vector<8x1x32xf32>
    %16 = vector.shape_cast %2 : vector<64x32xf32> to vector<1x64x32xf32>
    %17 = vector.broadcast %15 : vector<8x1x32xf32> to vector<8x64x32xf32>
    %18 = vector.broadcast %16 : vector<1x64x32xf32> to vector<8x64x32xf32>
    %19 = arith.mulf %17, %18 : vector<8x64x32xf32>
    %cst_5 = arith.constant dense<0.000000e+00> : vector<8x64xf32>
    %20 = vector.multi_reduction <add>, %19, %cst_5 [2] : vector<8x64x32xf32> to vector<8x64xf32>
    %21 = vector.extract_strided_slice %0 {offsets = [0, 1], sizes = [8, 8], strides = [1, 1]} : vector<8x9xi32> to vector<8x8xi32>
    %22 = tpu.iota {dimensions = array<i32: 2>} : vector<8x8x64xi32>
    %23 = vector.shape_cast %21 : vector<8x8xi32> to vector<8x8x1xi32>
    %24 = vector.broadcast %23 : vector<8x8x1xi32> to vector<8x8x64xi32>
    %25 = arith.cmpi eq, %22, %24 : vector<8x8x64xi32>
    %26 = arith.extui %25 : vector<8x8x64xi1> to vector<8x8x64xi32>
    %27 = arith.sitofp %26 : vector<8x8x64xi32> to vector<8x8x64xf32>
    %28 = vector.shape_cast %20 : vector<8x64xf32> to vector<8x1x64xf32>
    %29 = vector.broadcast %28 : vector<8x1x64xf32> to vector<8x8x64xf32>
    %30 = arith.mulf %27, %29 : vector<8x8x64xf32>
    %cst_6 = arith.constant dense<0.000000e+00> : vector<8x8xf32>
    %31 = vector.multi_reduction <add>, %30, %cst_6 [2] : vector<8x8x64xf32> to vector<8x8xf32>
    %cst_7 = arith.constant 1.000000e+01 : f32
    %32 = vector.broadcast %cst_7 : f32 to vector<8x8xf32>
    %33 = arith.mulf %31, %32 : vector<8x8xf32>
    %c0_8 = arith.constant 0 : index
    %c0_9 = arith.constant 0 : index
    %34 = vector.load %arg4[%c0_8, %c0_9] : memref<8x8xf32, #tpu.memory_space<vmem>>, vector<8x8xf32>
    tpu.vector_store %arg4[%c0_8, %c0_9], %33 {strides = array<i32>} : memref<8x8xf32, #tpu.memory_space<vmem>>, vector<8x8xf32>,
    return
  }
  func.func @transform_0(%arg0: i32) -> (i32, i32) {
    %c0_i32 = arith.constant 0 : i32
    %c0_i32_0 = arith.constant 0 : i32
    return %arg0, %c0_i32 : i32, i32
  }
  func.func @transform_1(%arg0: i32) -> (i32, i32) {
    %c0_i32 = arith.constant 0 : i32
    %c0_i32_0 = arith.constant 0 : i32
    %c0_i32_1 = arith.constant 0 : i32
    return %c0_i32, %c0_i32_0 : i32, i32
  }
  func.func @transform_2(%arg0: i32) -> (i32, i32) {
    %c0_i32 = arith.constant 0 : i32
    %c0_i32_0 = arith.constant 0 : i32
    %c0_i32_1 = arith.constant 0 : i32
    return %c0_i32, %c0_i32_0 : i32, i32
  }
  func.func @transform_3(%arg0: i32) -> (i32, i32) {
    %c0_i32 = arith.constant 0 : i32
    %c0_i32_0 = arith.constant 0 : i32
    return %arg0, %c0_i32 : i32, i32
  }
}

</mosaic_0001>

<bundles_post_ra>
// kernel: tpu_custom_call.1
= control target key start
LH: loop header
LB: loop body
LE: loop exit
PB: predicated region body
PF: predicated region fallthrough
CT: control target
= control target key end

     0   :  { %v28_v1 = vlaneseq  ;;  %s1972_s0 = inlined_call_operand.vmem [shape: s32[8,9], index: 0, kind: input, shape index: {}]   ;;  %s1973_s1 = inlined_call_operand.vmem [shape: f32[32,32], index: 1, kind: input, shape index: {}]   ;;  %s1974_s2 = inlined_call_operand.vmem [shape: f32[64,32], index: 2, kind: input, shape index: {}]   ;;  %s1975_s3 = inlined_call_operand.hbm [shape: f32[8,8], index: 3, kind: output, shape index: {}]  }
   0x1   :  { %v1288_v0 = vld [vmem:[%s1972_s0] sm:$0xff] }
   0x2   :  { %8 = vsyncpa [#allocation3], 0  ;;  %v1262_v2 = vmov 0   ;;  %v1291_v3 = vshrl.u32 %v28_v1, 7  ;;  %v1305_v16 = vand.u32 127, %v28_v1  ;;  %v1263_v18 = vmov 0.0  }
   0x3   :  { %1239 = vset.pattern.permute.xlu0 %v1262_v2  ;;  %v1330_v36 = vld [vmem:[%s1973_s1 + $0x8] sm:$0xff]  ;;  %v1335_v37 = vld [vmem:[%s1973_s1] sm:$0xff]  ;;  %vm220_vm1 = vcmask 261120   ;;  %v1342_v42 = vld [vmem:[%s1973_s1 + $0x10] sm:$0xff]  ;;  %vm742_vm2 = vcmask 130112   ;;  %vm749_vm3 = vcmask 195712  }
   0x4   :  { %31 = vperm.xlu0 %1239, %v1288_v0   ;;  %v57_v4 = vsub.s32 1, %v1291_v3  ;;  %v38_v5 = vsub.s32 0, %v1291_v3  ;;  %v76_v6 = vsub.s32 2, %v1291_v3  ;;  %v95_v7 = vsub.s32 3, %v1291_v3  ;;  %v1347_v43 = vld [vmem:[%s1973_s1 + $0x18] sm:$0xff] }
   0x5   :  { %v114_v12 = vsub.s32 4, %v1291_v3  ;;  %v133_v13 = vsub.s32 5, %v1291_v3  ;;  %v152_v26 = vsub.s32 6, %v1291_v3  ;;  %v171_v28 = vsub.s32 7, %v1291_v3 }
   0x6   :  { %v592_v8 = vrot.slane %v1288_v0, %v57_v4  ;;  %v584_v9 = vrot.slane %v1288_v0, %v38_v5  ;;  %v600_v10 = vrot.slane %v1288_v0, %v76_v6  ;;  %v608_v11 = vrot.slane %v1288_v0, %v95_v7 }
   0x7   :  { %v616_v14 = vrot.slane %v1288_v0, %v114_v12  ;;  %v624_v15 = vrot.slane %v1288_v0, %v133_v13  ;;  %vm756_vm4 = vcmask 261312   ;;  %vm763_vm5 = vcmask 326912  }
   0x8   :  { %595 = vbcast.lane.b32.xlu1 %v592_v8, 257  ;;  %587 = vbcast.lane.b32.xlu0 %v584_v9, 257  ;;  %vm770_vm6 = vcmask 392512   ;;  %vm777_vm7 = vcmask 458112   ;;  %vm784_vm8 = vcmask 523712   ;;  %vm1130_vm10 = vcmask 523264  }
   0xc   :  { %603 = vbcast.lane.b32.xlu1 %v600_v10, 257  ;;  %611 = vbcast.lane.b32.xlu0 %v608_v11, 257 }
  0x10   :  { %619 = vbcast.lane.b32.xlu1 %v616_v14, 257  ;;  %627 = vbcast.lane.b32.xlu0 %v624_v15, 257 }
  0x7a   :  { %v1315_v30 = vpop.permute.xlu1 %595 }
  0x7b   :  { %vm646_vm11 = vcmp.eq.s32.totalorder %v1305_v16, %v1315_v30 }
  0x7e   :  { %v1319_v32 = vpop.permute.xlu1 %603 }
  0x7f   :  { %v32_v17 = vpop.permute.xlu0 %31  ;;  %vm647_vm12 = vcmp.eq.s32.totalorder %v1305_v16, %v1319_v32 }
  0x80   :  { %vm33_vm0 = vcmp.eq.s32.totalorder %v1305_v16, %v32_v17 }
  0x81   :  { %v1227_v19 = vsel %vm33_vm0, 1.0, %v1263_v18 }
  0x82   :  { %v39_v20 = vrot.slane %v1227_v19, %v38_v5  ;;  %v58_v21 = vrot.slane %v1227_v19, %v57_v4  ;;  %v77_v22 = vrot.slane %v1227_v19, %v76_v6  ;;  %v96_v23 = vrot.slane %v1227_v19, %v95_v7  ;;  %v1323_v34 = vpop.permute.xlu1 %619 }
  0x83   :  { %v115_v24 = vrot.slane %v1227_v19, %v114_v12  ;;  %v134_v25 = vrot.slane %v1227_v19, %v133_v13  ;;  %v153_v27 = vrot.slane %v1227_v19, %v152_v26  ;;  %v172_v29 = vrot.slane %v1227_v19, %v171_v28  ;;  %v1317_v31 = vpop.permute.xlu0 %587 }
  0x84   :  { %45 = vbcast.lane.b32.xlu1 %v39_v20, 264  ;;  %41 = vbcast.lane.b32.xlu0 %v39_v20, 256  ;;  %vm645_vm9 = vcmp.eq.s32.totalorder %v1305_v16, %v1317_v31  ;;  %vm649_vm14 = vcmp.eq.s32.totalorder %v1305_v16, %v1323_v34 }
  0x87   :  { %v1321_v33 = vpop.permute.xlu0 %611 }
  0x88   :  { %49 = vbcast.lane.b32.xlu1 %v39_v20, 272  ;;  %53 = vbcast.lane.b32.xlu0 %v39_v20, 280  ;;  %v1366_v20 = vld [vmem:[%s1974_s2 + $0x8] sm:$0xff]  ;;  %vm648_vm13 = vcmp.eq.s32.totalorder %v1305_v16, %v1321_v33 }
  0x8b   :  { %v1325_v35 = vpop.permute.xlu0 %627 }
  0x8c   :  { %60 = vbcast.lane.b32.xlu1 %v58_v21, 256  ;;  %64 = vbcast.lane.b32.xlu0 %v58_v21, 264  ;;  %vm650_vm15 = vcmp.eq.s32.totalorder %v1305_v16, %v1325_v35 }
  0x90   :  { %68 = vbcast.lane.b32.xlu1 %v58_v21, 272  ;;  %72 = vbcast.lane.b32.xlu0 %v58_v21, 280  ;;  %v1371_v21 = vld [vmem:[%s1974_s2] sm:$0xff] }
  0x94   :  { %79 = vbcast.lane.b32.xlu1 %v77_v22, 256  ;;  %83 = vbcast.lane.b32.xlu0 %v77_v22, 264 }
  0x98   :  { %98 = vbcast.lane.b32.xlu1 %v96_v23, 256  ;;  %102 = vbcast.lane.b32.xlu0 %v96_v23, 264 }
  0x9c   :  { %87 = vbcast.lane.b32.xlu1 %v77_v22, 272  ;;  %117 = vbcast.lane.b32.xlu0 %v115_v24, 256 }
  0xa0   :  { %121 = vbcast.lane.b32.xlu1 %v115_v24, 264  ;;  %106 = vbcast.lane.b32.xlu0 %v96_v23, 272 }
  0xa4   :  { %136 = vbcast.lane.b32.xlu1 %v134_v25, 256  ;;  %140 = vbcast.lane.b32.xlu0 %v134_v25, 264 }
  0xa8   :  { %91 = vbcast.lane.b32.xlu1 %v77_v22, 280  ;;  %125 = vbcast.lane.b32.xlu0 %v115_v24, 272 }
  0xac   :  { %155 = vbcast.lane.b32.xlu1 %v153_v27, 256  ;;  %159 = vbcast.lane.b32.xlu0 %v153_v27, 264 }
  0xb0   :  { %110 = vbcast.lane.b32.xlu1 %v96_v23, 280  ;;  %144 = vbcast.lane.b32.xlu0 %v134_v25, 272 }
  0xb4   :  { %174 = vbcast.lane.b32.xlu1 %v172_v29, 256  ;;  %178 = vbcast.lane.b32.xlu0 %v172_v29, 264 }
  0xb8   :  { %129 = vbcast.lane.b32.xlu1 %v115_v24, 280  ;;  %163 = vbcast.lane.b32.xlu0 %v153_v27, 272  ;;  %v1376_v24 = vld [vmem:[%s1974_s2 + $0x10] sm:$0xff] }
  0xbc   :  { %148 = vbcast.lane.b32.xlu1 %v134_v25, 280  ;;  %182 = vbcast.lane.b32.xlu0 %v172_v29, 272  ;;  %v1381_v25 = vld [vmem:[%s1974_s2 + $0x18] sm:$0xff] }
  0xc0   :  { %167 = vbcast.lane.b32.xlu1 %v153_v27, 280  ;;  %186 = vbcast.lane.b32.xlu0 %v172_v29, 280 }
  0xf6   :  { %v46_v38 = vpop.permute.xlu1 %45  ;;  %v42_v39 = vpop.permute.xlu0 %41 }
  0xf7   :  { %v189_v40 = vmul.f32 %v46_v38, %v1330_v36  ;;  %v188_v41 = vmul.f32 %v42_v39, %v1335_v37 }
  0xf9   :  { %v222_v44 = vsel %vm220_vm1, %v189_v40, 0.0  ;;  %v221_v45 = vsel %vm220_vm1, %v188_v41, 0.0 }
  0xfa   :  { %v50_v46 = vpop.permute.xlu1 %49  ;;  %v54_v47 = vpop.permute.xlu0 %53  ;;  %v223_v50 = vadd.f32 %v222_v44, %v221_v45 }
  0xfb   :  { %v190_v48 = vmul.f32 %v50_v46, %v1342_v42  ;;  %v191_v49 = vmul.f32 %v54_v47, %v1347_v43 }
  0xfd   :  { %v224_v51 = vsel %vm220_vm1, %v190_v48, 0.0  ;;  %v226_v55 = vsel %vm220_vm1, %v191_v49, 0.0  ;;  %v1394_v48 = vld [vmem:[%s1974_s2 + $0x20] sm:$0xff]  ;;  %v1399_v49 = vld [vmem:[%s1974_s2 + $0x28] sm:$0xff] }
  0xfe   :  { %v225_v52 = vadd.f32 %v224_v51, %v223_v50  ;;  %v61_v53 = vpop.permute.xlu1 %60  ;;  %v65_v54 = vpop.permute.xlu0 %64 }
  0xff   :  { %v192_v56 = vmul.f32 %v61_v53, %v1335_v37  ;;  %v193_v57 = vmul.f32 %v65_v54, %v1330_v36 }
 0x100   :  { %v227_v58 = vadd.f32 %v226_v55, %v225_v52 }
 0x101   :  { %v234_v59 = vsel %vm220_vm1, %v192_v56, 0.0  ;;  %v235_v60 = vsel %vm220_vm1, %v193_v57, 0.0 }
 0x102   :  { %v228_v61 = vrot.slane %v227_v58, 4  ;;  %v69_v62 = vpop.permute.xlu1 %68  ;;  %v73_v63 = vpop.permute.xlu0 %72  ;;  %v236_v5 = vadd.f32 %v235_v60, %v234_v59  ;;  %v1411_v60 = vld [vmem:[%s1974_s2 + $0x30] sm:$0xff] }
 0x103   :  { %v194_v1 = vmul.f32 %v69_v62, %v1342_v42  ;;  %v195_v2 = vmul.f32 %v73_v63, %v1347_v43 }
 0x104   :  { %v229_v4 = vadd.f32 %v228_v61, %v227_v58  ;;  %v1416_v61 = vld [vmem:[%s1974_s2 + $0x38] sm:$0xff]  ;;  %s1264_s2 = smov [#allocation2]  }
 0x105   :  { %v237_v6 = vsel %vm220_vm1, %v194_v1, 0.0  ;;  %v239_v11 = vsel %vm220_vm1, %v195_v2, 0.0  ;;  %s1219_s9 = sshll.u32 %s1264_s2, 4  ;;  %s1220_s9 = int_to_ptr.vmem [resolvable:$true] %s1219_s9 }
 0x106   :  { %v230_v7 = vrot.slane %v229_v4, 2  ;;  %v238_v8 = vadd.f32 %v237_v6, %v236_v5  ;;  %v80_v9 = vpop.permute.xlu1 %79  ;;  %v84_v10 = vpop.permute.xlu0 %83  ;;  %s1240_s10 = scalar_lea.vmem %s1220_s9, 128  ;;  %p1245_p1 = scmp.lt.s32.totalorder %s1220_s9, %s1220_s9 }
 0x107   :  { %v196_v50 = vmul.f32 %v80_v9, %v1335_v37  ;;  %v197_v51 = vmul.f32 %v84_v10, %v1330_v36  ;;  %p1241_p0 = scmp.ne.s32.totalorder %s1220_s9, %s1240_s10  ;;  %p1246_p2 = scmp.lt.s32.totalorder %s1240_s10, %s1240_s10 }
 0x108   :  { %v231_v12 = vadd.f32 %v230_v7, %v229_v4  ;;  %v240_v13 = vadd.f32 %v239_v11, %v238_v8 }
 0x109   :  { %v247_v62 = vsel %vm220_vm1, %v196_v50, 0.0  ;;  %v248_v63 = vsel %vm220_vm1, %v197_v51, 0.0  ;;  %p1247_p3 = por %p1246_p2, %p1245_p1 }
 0x10a   :  { %v232_v14 = vrot.slane %v231_v12, 1  ;;  %v241_v15 = vrot.slane %v240_v13, 4  ;;  %v99_v17 = vpop.permute.xlu1 %98  ;;  %v103_v19 = vpop.permute.xlu0 %102  ;;  %v249_v10 = vadd.f32 %v248_v63, %v247_v62 }
 0x10b   :  { %v200_v11 = vmul.f32 %v99_v17, %v1335_v37  ;;  %p1248_p4 = pnand %p1247_p3, %p1241_p0 }
 0x10c   :  { %v233_v22 = vadd.f32 %v232_v14, %v231_v12  ;;  %v242_v23 = vadd.f32 %v241_v15, %v240_v13  ;;  %v201_v12 = vmul.f32 %v103_v19, %v1330_v36 }
 0x10e   :  { %v243_v27 = vrot.slane %v242_v23, 2  ;;  %v88_v29 = vpop.permute.xlu1 %87  ;;  %v1383_v38 = vpop.permute.xlu0 %117  ;;  %v326_v39 = vmul.f32 %v233_v22, %v1366_v20  ;;  %v325_v40 = vmul.f32 %v233_v22, %v1371_v21  ;;  %v327_v41 = vmul.f32 %v233_v22, %v1376_v24 }
 0x10f   :  { %v328_v47 = vmul.f32 %v233_v22, %v1381_v25  ;;  %v198_v55 = vmul.f32 %v88_v29, %v1342_v42  ;;  %v329_v58 = vmul.f32 %v233_v22, %v1394_v48  ;;  %v330_v59 = vmul.f32 %v233_v22, %v1399_v49 }
 0x110   :  { %v244_v44 = vadd.f32 %v243_v27, %v242_v23  ;;  %v392_v45 = vsel %vm220_vm1, %v326_v39, 0.0  ;;  %v389_v46 = vsel %vm220_vm1, %v325_v40, 0.0  ;;  %v395_v56 = vsel %vm220_vm1, %v327_v41, 0.0 }
 0x111   :  { %393 = vadd.xlane.f32.xlu0 %v392_v45  ;;  %390 = vadd.xlane.f32.xlu1 %v389_v46  ;;  %v398_v57 = vsel %vm220_vm1, %v328_v47, 0.0  ;;  %v250_v5 = vsel %vm220_vm1, %v198_v55, 0.0  ;;  %v401_v6 = vsel %vm220_vm1, %v329_v58, 0.0  ;;  %v404_v7 = vsel %vm220_vm1, %v330_v59, 0.0 }
 0x112   :  { %v122_v52 = vpop.permute.xlu1 %121  ;;  %v107_v53 = vpop.permute.xlu0 %106  ;;  %v245_v54 = vrot.slane %v244_v44, 1  ;;  %v331_v8 = vmul.f32 %v233_v22, %v1411_v60  ;;  %v332_v9 = vmul.f32 %v233_v22, %v1416_v61  ;;  %v251_v15 = vadd.f32 %v250_v5, %v249_v10 }
 0x113   :  { %v202_v23 = vmul.f32 %v107_v53, %v1342_v42  ;;  %v260_v41 = vsel %vm220_vm1, %v200_v11, 0.0 }
 0x114   :  { %v1420_v4 = vadd.f32 %v245_v54, %v244_v44  ;;  %v407_v22 = vsel %vm220_vm1, %v331_v8, 0.0  ;;  %v410_v39 = vsel %vm220_vm1, %v332_v9, 0.0  ;;  %v261_v44 = vsel %vm220_vm1, %v201_v12, 0.0 }
 0x115   :  { %396 = vadd.xlane.f32.xlu0 %v395_v56  ;;  %399 = vadd.xlane.f32.xlu1 %v398_v57  ;;  %v263_v50 = vsel %vm220_vm1, %v202_v23, 0.0  ;;  %v262_v58 = vadd.f32 %v261_v44, %v260_v41  ;;  %v204_v8 = vmul.f32 %v1383_v38, %v1335_v37  ;;  %v205_v9 = vmul.f32 %v122_v52, %v1330_v36 }
 0x116   :  { %v137_v1 = vpop.permute.xlu1 %136  ;;  %v141_v2 = vpop.permute.xlu0 %140  ;;  %v1433_v29 = vmul.f32 %v1420_v4, %v1416_v61  ;;  %v334_v17 = vmul.f32 %v1420_v4, %v1366_v20  ;;  %v333_v19 = vmul.f32 %v1420_v4, %v1371_v21  ;;  %v335_v57 = vmul.f32 %v1420_v4, %v1376_v24 }
 0x117   :  { %v264_v10 = vadd.f32 %v263_v50, %v262_v58  ;;  %v208_v12 = vmul.f32 %v137_v1, %v1335_v37  ;;  %v273_v52 = vsel %vm220_vm1, %v204_v8, 0.0 }
 0x118   :  { %v416_v55 = vsel %vm220_vm1, %v334_v17, 0.0  ;;  %v413_v56 = vsel %vm220_vm1, %v333_v19, 0.0  ;;  %v419_v23 = vsel %vm220_vm1, %v335_v57, 0.0 }
 0x119   :  { %402 = vadd.xlane.f32.xlu0 %v401_v6  ;;  %405 = vadd.xlane.f32.xlu1 %v404_v7  ;;  %v286_v41 = vsel %vm220_vm1, %v208_v12, 0.0 }
 0x11a   :  { %v92_v13 = vpop.permute.xlu1 %91  ;;  %v126_v14 = vpop.permute.xlu0 %125 }
 0x11b   :  { %v199_v27 = vmul.f32 %v92_v13, %v1347_v43  ;;  %v209_v13 = vmul.f32 %v141_v2, %v1330_v36 }
 0x11d   :  { %v252_v40 = vsel %vm220_vm1, %v199_v27, 0.0  ;;  %408 = vadd.xlane.f32.xlu0 %v407_v22  ;;  %411 = vadd.xlane.f32.xlu1 %v410_v39  ;;  %v206_v27 = vmul.f32 %v126_v14, %v1342_v42  ;;  %v287_v44 = vsel %vm220_vm1, %v209_v13, 0.0 }
 0x11e   :  { %v253_v45 = vadd.f32 %v252_v40, %v251_v15  ;;  %v156_v46 = vpop.permute.xlu1 %155  ;;  %v160_v47 = vpop.permute.xlu0 %159  ;;  %v274_v40 = vsel %vm220_vm1, %v205_v9, 0.0  ;;  %v288_v57 = vadd.f32 %v287_v44, %v286_v41 }
 0x11f   :  { %v212_v51 = vmul.f32 %v156_v46, %v1335_v37  ;;  %v213_v53 = vmul.f32 %v160_v47, %v1330_v36  ;;  %v276_v46 = vsel %vm220_vm1, %v206_v27, 0.0 }
 0x120   :  { %v254_v54 = vrot.slane %v253_v45, 4 }
 0x121   :  { %v299_v59 = vsel %vm220_vm1, %v212_v51, 0.0  ;;  %v300_v62 = vsel %vm220_vm1, %v213_v53, 0.0  ;;  %417 = vadd.xlane.f32.xlu1 %v416_v55  ;;  %414 = vadd.xlane.f32.xlu0 %v413_v56  ;;  %v275_v53 = vadd.f32 %v274_v40, %v273_v52 }
 0x122   :  { %v255_v63 = vadd.f32 %v254_v54, %v253_v45  ;;  %v301_v5 = vadd.f32 %v300_v62, %v299_v59  ;;  %v111_v6 = vpop.permute.xlu1 %110  ;;  %v145_v7 = vpop.permute.xlu0 %144 }
 0x123   :  { %v203_v11 = vmul.f32 %v111_v6, %v1347_v43  ;;  %v210_v47 = vmul.f32 %v145_v7, %v1342_v42  ;;  %v277_v62 = vadd.f32 %v276_v46, %v275_v53 }
 0x124   :  { %v256_v15 = vrot.slane %v255_v63, 2 }
 0x125   :  { %v265_v22 = vsel %vm220_vm1, %v203_v11, 0.0  ;;  %420 = vadd.xlane.f32.xlu0 %v419_v23  ;;  %v289_v8 = vsel %vm220_vm1, %v210_v47, 0.0 }
 0x126   :  { %v257_v39 = vadd.f32 %v256_v15, %v255_v63  ;;  %v266_v17 = vadd.f32 %v265_v22, %v264_v10  ;;  %v175_v38 = vpop.permute.xlu1 %174  ;;  %v179_v19 = vpop.permute.xlu0 %178  ;;  %v290_v40 = vadd.f32 %v289_v8, %v288_v57 }
 0x127   :  { %v216_v1 = vmul.f32 %v175_v38, %v1335_v37  ;;  %v217_v2 = vmul.f32 %v179_v19, %v1330_v36  ;;  %v336_v19 = vmul.f32 %v1420_v4, %v1381_v25 }
 0x128   :  { %v258_v14 = vrot.slane %v257_v39, 1  ;;  %v267_v45 = vrot.slane %v266_v17, 4 }
 0x129   :  { %v312_v50 = vsel %vm220_vm1, %v216_v1, 0.0  ;;  %v313_v51 = vsel %vm220_vm1, %v217_v2, 0.0  ;;  %v422_v53 = vsel %vm220_vm1, %v336_v19, 0.0 }
 0x12a   :  { %v1472_v54 = vadd.f32 %v258_v14, %v257_v39  ;;  %v268_v37 = vadd.f32 %v267_v45, %v266_v17  ;;  %v314_v55 = vadd.f32 %v313_v51, %v312_v50  ;;  %v130_v36 = vpop.permute.xlu1 %129  ;;  %v164_v56 = vpop.permute.xlu0 %163 }
 0x12b   :  { %v207_v58 = vmul.f32 %v130_v36, %v1347_v43  ;;  %v214_v59 = vmul.f32 %v164_v56, %v1342_v42 }
 0x12c   :  { %v269_v63 = vrot.slane %v268_v37, 2  ;;  %v342_v6 = vmul.f32 %v1472_v54, %v1366_v20  ;;  %v341_v7 = vmul.f32 %v1472_v54, %v1371_v21  ;;  %v343_v11 = vmul.f32 %v1472_v54, %v1376_v24 }
 0x12d   :  { %v278_v9 = vsel %vm220_vm1, %v207_v58, 0.0  ;;  %v302_v10 = vsel %vm220_vm1, %v214_v59, 0.0  ;;  %v344_v8 = vmul.f32 %v1472_v54, %v1381_v25 }
 0x12e   :  { %v270_v12 = vadd.f32 %v269_v63, %v268_v37  ;;  %v279_v13 = vadd.f32 %v278_v9, %v277_v62  ;;  %v303_v15 = vadd.f32 %v302_v10, %v301_v5  ;;  %v149_v23 = vpop.permute.xlu1 %148  ;;  %v183_v27 = vpop.permute.xlu0 %182  ;;  %v440_v22 = vsel %vm220_vm1, %v342_v6, 0.0 }
 0x12f   :  { %v211_v39 = vmul.f32 %v149_v23, %v1347_v43  ;;  %v218_v17 = vmul.f32 %v183_v27, %v1342_v42  ;;  %441 = vadd.xlane.f32.xlu0 %v440_v22  ;;  %v437_v38 = vsel %vm220_vm1, %v341_v7, 0.0  ;;  %v443_v41 = vsel %vm220_vm1, %v343_v11, 0.0 }
 0x130   :  { %v271_v52 = vrot.slane %v270_v12, 1  ;;  %v280_v1 = vrot.slane %v279_v13, 4  ;;  %438 = vadd.xlane.f32.xlu1 %v437_v38  ;;  %v337_v9 = vmul.f32 %v1420_v4, %v1394_v48 }
 0x131   :  { %v291_v5 = vsel %vm220_vm1, %v211_v39, 0.0  ;;  %v315_v2 = vsel %vm220_vm1, %v218_v17, 0.0  ;;  %v446_v17 = vsel %vm220_vm1, %v344_v8, 0.0 }
 0x132   :  { %v1494_v44 = vadd.f32 %v271_v52, %v270_v12  ;;  %v281_v14 = vadd.f32 %v280_v1, %v279_v13  ;;  %v292_v42 = vadd.f32 %v291_v5, %v290_v40  ;;  %v316_v45 = vadd.f32 %v315_v2, %v314_v55  ;;  %v168_v46 = vpop.permute.xlu1 %167  ;;  %v187_v47 = vpop.permute.xlu0 %186 }
 0x133   :  { %v215_v50 = vmul.f32 %v168_v46, %v1347_v43  ;;  %v219_v51 = vmul.f32 %v187_v47, %v1347_v43  ;;  %444 = vadd.xlane.f32.xlu0 %v443_v41  ;;  %v425_v38 = vsel %vm220_vm1, %v337_v9, 0.0 }
 0x134   :  { %v282_v37 = vrot.slane %v281_v14, 2  ;;  %v293_v36 = vrot.slane %v292_v42, 4  ;;  %423 = vadd.xlane.f32.xlu1 %v422_v53  ;;  %v350_v56 = vmul.f32 %v1494_v44, %v1366_v20  ;;  %v349_v57 = vmul.f32 %v1494_v44, %v1371_v21 }
 0x135   :  { %v304_v55 = vsel %vm220_vm1, %v215_v50, 0.0  ;;  %v317_v58 = vsel %vm220_vm1, %v219_v51, 0.0  ;;  %v351_v19 = vmul.f32 %v1494_v44, %v1376_v24 }
 0x136   :  { %v283_v59 = vadd.f32 %v282_v37, %v281_v14  ;;  %v294_v62 = vadd.f32 %v293_v36, %v292_v42  ;;  %v305_v63 = vadd.f32 %v304_v55, %v303_v15  ;;  %v318_v43 = vadd.f32 %v317_v58, %v316_v45 }
 0x137   :  { %v464_v6 = vsel %vm220_vm1, %v350_v56, 0.0  ;;  %v461_v7 = vsel %vm220_vm1, %v349_v57, 0.0  ;;  %v1513_v15 = vmul.f32 %v1472_v54, %v1416_v61  ;;  %v338_v14 = vmul.f32 %v1420_v4, %v1399_v49 }
 0x138   :  { %v284_v10 = vrot.slane %v283_v59, 1  ;;  %v295_v11 = vrot.slane %v294_v62, 2  ;;  %v306_v12 = vrot.slane %v305_v63, 4  ;;  %v319_v13 = vrot.slane %v318_v43, 4  ;;  %465 = vadd.xlane.f32.xlu0 %v464_v6  ;;  %462 = vadd.xlane.f32.xlu1 %v461_v7 }
 0x139   :  { %v467_v45 = vsel %vm220_vm1, %v351_v19, 0.0  ;;  %v428_v37 = vsel %vm220_vm1, %v338_v14, 0.0  ;;  %v345_v57 = vmul.f32 %v1472_v54, %v1394_v48  ;;  %v352_v55 = vmul.f32 %v1494_v44, %v1381_v25 }
 0x13a   :  { %v1515_v23 = vadd.f32 %v284_v10, %v283_v59  ;;  %v307_v27 = vadd.f32 %v306_v12, %v305_v63  ;;  %v320_v22 = vadd.f32 %v319_v13, %v318_v43  ;;  %v296_v39 = vadd.f32 %v295_v11, %v294_v62 }
 0x13b   :  { %v449_v8 = vsel %vm220_vm1, %v345_v57, 0.0  ;;  %v470_v9 = vsel %vm220_vm1, %v352_v55, 0.0  ;;  %v1560_v12 = vmul.f32 %v1494_v44, %v1416_v61  ;;  %v347_v57 = vmul.f32 %v1472_v54, %v1411_v60 }
 0x13c   :  { %v308_v52 = vrot.slane %v307_v27, 2  ;;  %v321_v40 = vrot.slane %v320_v22, 2  ;;  %447 = vadd.xlane.f32.xlu0 %v446_v17  ;;  %426 = vadd.xlane.f32.xlu1 %v425_v38  ;;  %v357_v1 = vmul.f32 %v1515_v23, %v1371_v21  ;;  %v297_v42 = vrot.slane %v296_v39, 1 }
 0x13d   :  { %v358_v46 = vmul.f32 %v1515_v23, %v1366_v20  ;;  %v359_v10 = vmul.f32 %v1515_v23, %v1376_v24  ;;  %v455_v55 = vsel %vm220_vm1, %v347_v57, 0.0  ;;  %v1698_v57 = vsub.s32 %v1305_v16, %v1291_v3 }
 0x13e   :  { %v309_v5 = vadd.f32 %v308_v52, %v307_v27  ;;  %v322_v2 = vadd.f32 %v321_v40, %v320_v22  ;;  %v485_v41 = vsel %vm220_vm1, %v357_v1, 0.0  ;;  %v1530_v36 = vadd.f32 %v297_v42, %v296_v39 }
 0x13f   :  { %v488_v56 = vsel %vm220_vm1, %v358_v46, 0.0  ;;  %v1567_v27 = vmul.f32 %v1515_v23, %v1416_v61  ;;  %v491_v17 = vsel %vm220_vm1, %v359_v10, 0.0  ;;  %v339_v52 = vmul.f32 %v1420_v4, %v1411_v60 }
 0x140   :  { %v310_v47 = vrot.slane %v309_v5, 1  ;;  %v323_v50 = vrot.slane %v322_v2, 1  ;;  %468 = vadd.xlane.f32.xlu1 %v467_v45  ;;  %486 = vadd.xlane.f32.xlu0 %v485_v41  ;;  %v365_v11 = vmul.f32 %v1530_v36, %v1371_v21  ;;  %v366_v19 = vmul.f32 %v1530_v36, %v1366_v20 }
 0x141   :  { %v431_v14 = vsel %vm220_vm1, %v339_v52, 0.0  ;;  %v346_v42 = vmul.f32 %v1472_v54, %v1399_v49  ;;  %v353_v45 = vmul.f32 %v1494_v44, %v1394_v48  ;;  %v368_v54 = vmul.f32 %v1530_v36, %v1381_v25 }
 0x142   :  { %v311_v51 = vadd.f32 %v310_v47, %v309_v5  ;;  %v324_v53 = vadd.f32 %v323_v50, %v322_v2  ;;  %v509_v38 = vsel %vm220_vm1, %v365_v11, 0.0  ;;  %v512_v4 = vsel %vm220_vm1, %v366_v19, 0.0 }
 0x143   :  { %v452_v46 = vsel %vm220_vm1, %v346_v42, 0.0  ;;  %v473_v47 = vsel %vm220_vm1, %v353_v45, 0.0  ;;  %v367_v50 = vmul.f32 %v1530_v36, %v1376_v24  ;;  %v369_v19 = vmul.f32 %v1530_v36, %v1394_v48 }
 0x144   :  { %489 = vadd.xlane.f32.xlu1 %v488_v56  ;;  %429 = vadd.xlane.f32.xlu0 %v428_v37  ;;  %v374_v58 = vmul.f32 %v311_v51, %v1366_v20  ;;  %v373_v59 = vmul.f32 %v311_v51, %v1371_v21  ;;  %v375_v62 = vmul.f32 %v311_v51, %v1376_v24 }
 0x145   :  { %v1541_v63 = vmul.f32 %v324_v53, %v1366_v20  ;;  %v1544_v43 = vmul.f32 %v324_v53, %v1371_v21  ;;  %v1547_v6 = vmul.f32 %v324_v53, %v1376_v24  ;;  %v1550_v7 = vmul.f32 %v311_v51, %v1381_v25 }
 0x146   :  { %v1563_v13 = vmul.f32 %v311_v51, %v1394_v48  ;;  %v1570_v22 = vmul.f32 %v324_v53, %v1381_v25  ;;  %v1573_v39 = vmul.f32 %v311_v51, %v1399_v49  ;;  %v1577_v21 = vmul.f32 %v1530_v36, %v1416_v61 }
 0x147   :  { %v1586_v40 = vmul.f32 %v324_v53, %v1394_v48  ;;  %v1589_v1 = vmul.f32 %v324_v53, %v1399_v49  ;;  %v1592_v5 = vmul.f32 %v311_v51, %v1411_v60  ;;  %v1595_v2 = vmul.f32 %v324_v53, %v1411_v60 }
 0x148   :  { %450 = vadd.xlane.f32.xlu1 %v449_v8  ;;  %471 = vadd.xlane.f32.xlu0 %v470_v9  ;;  %v1598_v41 = vmul.f32 %v311_v51, %v1416_v61  ;;  %v1601_v20 = vmul.f32 %v324_v53, %v1416_v61  ;;  %v360_v61 = vmul.f32 %v1515_v23, %v1381_v25  ;;  %v515_v53 = vsel %vm220_vm1, %v367_v50, 0.0 }
 0x149   :  { %v536_v37 = vsel %vm220_vm1, %v374_v58, 0.0  ;;  %v533_v56 = vsel %vm220_vm1, %v373_v59, 0.0  ;;  %v434_v24 = vsel %vm220_vm1, %v1433_v29, 0.0  ;;  %v361_v8 = vmul.f32 %v1515_v23, %v1394_v48 }
 0x14a   :  { %v494_v51 = vsel %vm220_vm1, %v360_v61, 0.0  ;;  %v354_v9 = vmul.f32 %v1494_v44, %v1399_v49  ;;  %v539_v10 = vsel %vm220_vm1, %v375_v62, 0.0  ;;  %v518_v29 = vsel %vm220_vm1, %v368_v54, 0.0 }
 0x14b   :  { %v497_v58 = vsel %vm220_vm1, %v361_v8, 0.0  ;;  %v560_v11 = vsel %vm220_vm1, %v1541_v63, 0.0  ;;  %v458_v62 = vsel %vm220_vm1, %v1513_v15, 0.0  ;;  %v362_v52 = vmul.f32 %v1515_v23, %v1399_v49 }
 0x14c   :  { %492 = vadd.xlane.f32.xlu1 %v491_v17  ;;  %510 = vadd.xlane.f32.xlu0 %v509_v38  ;;  %v476_v59 = vsel %vm220_vm1, %v354_v9, 0.0  ;;  %v557_v17 = vsel %vm220_vm1, %v1544_v43, 0.0  ;;  %v355_v38 = vmul.f32 %v1494_v44, %v1411_v60  ;;  %v521_v63 = vsel %vm220_vm1, %v369_v19, 0.0 }
 0x14d   :  { %v500_v43 = vsel %vm220_vm1, %v362_v52, 0.0  ;;  %v563_v44 = vsel %vm220_vm1, %v1547_v6, 0.0  ;;  %v542_v15 = vsel %vm220_vm1, %v1550_v7, 0.0  ;;  %v363_v48 = vmul.f32 %v1515_v23, %v1411_v60 }
 0x14e   :  { %v479_v25 = vsel %vm220_vm1, %v355_v38, 0.0  ;;  %v370_v42 = vmul.f32 %v1530_v36, %v1399_v49  ;;  %v545_v6 = vsel %vm220_vm1, %v1563_v13, 0.0  ;;  %v506_v23 = vsel %vm220_vm1, %v1567_v27, 0.0 }
 0x14f   :  { %v566_v45 = vsel %vm220_vm1, %v1570_v22, 0.0  ;;  %v548_v49 = vsel %vm220_vm1, %v1573_v39, 0.0  ;;  %v569_v27 = vsel %vm220_vm1, %v1586_v40, 0.0  ;;  %v575_v22 = vsel %vm220_vm1, %v1595_v2, 0.0 }
 0x150   :  { %513 = vadd.xlane.f32.xlu1 %v512_v4  ;;  %432 = vadd.xlane.f32.xlu0 %v431_v14  ;;  %v503_v4 = vsel %vm220_vm1, %v363_v48, 0.0  ;;  %v482_v14 = vsel %vm220_vm1, %v1560_v12, 0.0  ;;  %v524_v7 = vsel %vm220_vm1, %v370_v42, 0.0  ;;  %v371_v12 = vmul.f32 %v1530_v36, %v1411_v60 }
 0x151   :  { %v572_v60 = vsel %vm220_vm1, %v1589_v1, 0.0  ;;  %v551_v36 = vsel %vm220_vm1, %v1592_v5, 0.0  ;;  %v554_v39 = vsel %vm220_vm1, %v1598_v41, 0.0  ;;  %v632_v5 = vrot.slane %v1288_v0, %v152_v26 }
 0x152   :  { %v527_v13 = vsel %vm220_vm1, %v371_v12, 0.0  ;;  %v640_v2 = vrot.slane %v1288_v0, %v171_v28  ;;  %v751_v0 = vadd.s32 4294967272, %v1305_v16  ;;  %v779_v19 = vadd.s32 4294967240, %v1305_v16 }
 0x154   :  { %453 = vadd.xlane.f32.xlu1 %v452_v46  ;;  %474 = vadd.xlane.f32.xlu0 %v473_v47  ;;  %v530_v46 = vsel %vm220_vm1, %v1577_v21, 0.0  ;;  %v578_v21 = vsel %vm220_vm1, %v1601_v20, 0.0  ;;  %v737_v20 = vadd.s32 4294967288, %v1305_v16 }
 0x156   :  { %v1701_v26 = vsub.s32 %v737_v20, %v1291_v3 }
 0x158   :  { %495 = vadd.xlane.f32.xlu1 %v494_v51  ;;  %516 = vadd.xlane.f32.xlu0 %v515_v53  ;;  %v744_v53 = vadd.s32 4294967280, %v1305_v16 }
 0x15a   :  { %v1705_v28 = vsub.s32 %v744_v53, %v1291_v3 }
 0x15c   :  { %537 = vadd.xlane.f32.xlu0 %v536_v37  ;;  %534 = vadd.xlane.f32.xlu1 %v533_v56 }
 0x160   :  { %456 = vadd.xlane.f32.xlu0 %v455_v55  ;;  %435 = vadd.xlane.f32.xlu1 %v434_v24  ;;  %v758_v55 = vadd.s32 4294967264, %v1305_v16 }
 0x164   :  { %498 = vadd.xlane.f32.xlu0 %v497_v58  ;;  %477 = vadd.xlane.f32.xlu1 %v476_v59  ;;  %v1713_v58 = vsub.s32 %v751_v0, %v1291_v3  ;;  %v765_v59 = vadd.s32 4294967256, %v1305_v16 }
 0x168   :  { %540 = vadd.xlane.f32.xlu0 %v539_v10  ;;  %519 = vadd.xlane.f32.xlu1 %v518_v29  ;;  %v1720_v29 = vsub.s32 %v758_v55, %v1291_v3 }
 0x16c   :  { %561 = vadd.xlane.f32.xlu0 %v560_v11  ;;  %558 = vadd.xlane.f32.xlu1 %v557_v17  ;;  %v772_v11 = vadd.s32 4294967248, %v1305_v16 }
 0x170   :  { %480 = vadd.xlane.f32.xlu0 %v479_v25  ;;  %459 = vadd.xlane.f32.xlu1 %v458_v62  ;;  %v1728_v62 = vsub.s32 %v765_v59, %v1291_v3 }
 0x174   :  { %522 = vadd.xlane.f32.xlu0 %v521_v63  ;;  %501 = vadd.xlane.f32.xlu1 %v500_v43 }
 0x178   :  { %564 = vadd.xlane.f32.xlu0 %v563_v44  ;;  %543 = vadd.xlane.f32.xlu1 %v542_v15  ;;  %v1736_v44 = vsub.s32 %v772_v11, %v1291_v3 }
 0x17c   :  { %504 = vadd.xlane.f32.xlu0 %v503_v4  ;;  %483 = vadd.xlane.f32.xlu1 %v482_v14  ;;  %v1743_v14 = vsub.s32 %v779_v19, %v1291_v3 }
 0x180   :  { %546 = vadd.xlane.f32.xlu0 %v545_v6  ;;  %525 = vadd.xlane.f32.xlu1 %v524_v7 }
 0x184   :  { %507 = vadd.xlane.f32.xlu0 %v506_v23  ;;  %567 = vadd.xlane.f32.xlu1 %v566_v45 }
 0x188   :  { %549 = vadd.xlane.f32.xlu0 %v548_v49  ;;  %528 = vadd.xlane.f32.xlu1 %v527_v13 }
 0x18c   :  { %531 = vadd.xlane.f32.xlu0 %v530_v46  ;;  %570 = vadd.xlane.f32.xlu1 %v569_v27 }
 0x190   :  { %573 = vadd.xlane.f32.xlu0 %v572_v60  ;;  %552 = vadd.xlane.f32.xlu1 %v551_v36  ;;  %v1228_v60 = vsel %vm645_vm9, 1.0, %v1263_v18  ;;  %vm1211_vm9 = vcmask 64512  }
 0x194   :  { %576 = vadd.xlane.f32.xlu0 %v575_v22  ;;  %555 = vadd.xlane.f32.xlu1 %v554_v39 }
 0x198   :  { %579 = vadd.xlane.f32.xlu1 %v578_v21 }
 0x19a   :  { %v394_v40 = vpop.xlane.xlu0 %393  ;;  %v391_v47 = vpop.xlane.xlu1 %390 }
 0x19b   :  { %v736_v8 = vrot.slane %v391_v47, %v1698_v57  ;;  %v741_v9 = vrot.slane %v394_v40, %v1701_v26 }
 0x19d   :  { %v743_v38 = vsel %vm742_vm2, %v741_v9, %v736_v8 }
 0x19e   :  { %v397_v1 = vpop.xlane.xlu0 %396  ;;  %v400_v50 = vpop.xlane.xlu1 %399 }
 0x19f   :  { %v748_v10 = vrot.slane %v397_v1, %v1705_v28  ;;  %v755_v25 = vrot.slane %v400_v50, %v1713_v58 }
 0x1a1   :  { %v750_v63 = vsel %vm749_vm3, %v748_v10, %v743_v38 }
 0x1a2   :  { %v403_v61 = vpop.xlane.xlu0 %402  ;;  %v406_v51 = vpop.xlane.xlu1 %405  ;;  %v757_v4 = vsel %vm756_vm4, %v755_v25, %v750_v63 }
 0x1a3   :  { %v762_v43 = vrot.slane %v403_v61, %v1720_v29  ;;  %v769_v48 = vrot.slane %v406_v51, %v1728_v62 }
 0x1a5   :  { %v764_v6 = vsel %vm763_vm5, %v762_v43, %v757_v4 }
 0x1a6   :  { %v409_v41 = vpop.xlane.xlu0 %408  ;;  %v412_v56 = vpop.xlane.xlu1 %411  ;;  %v771_v45 = vsel %vm770_vm6, %v769_v48, %v764_v6 }
 0x1a7   :  { %v776_v7 = vrot.slane %v409_v41, %v1736_v44  ;;  %v783_v23 = vrot.slane %v412_v56, %v1743_v14 }
 0x1a9   :  { %635 = vbcast.lane.b32.xlu1 %v632_v5, 257  ;;  %v778_v13 = vsel %vm777_vm7, %v776_v7, %v771_v45 }
 0x1aa   :  { %643 = vbcast.lane.b32.xlu0 %v640_v2, 257  ;;  %v1694_v37 = vpop.xlane.xlu0 %414  ;;  %v1716_v54 = vpop.xlane.xlu1 %417  ;;  %v785_v27 = vsel %vm784_vm8, %v783_v23, %v778_v13 }
 0x1ab   :  { %v1122_v36 = vmul.f32 %v1228_v60, %v785_v27  ;;  %v793_v56 = vrot.slane %v1716_v54, %v1701_v26  ;;  %v789_v0 = vrot.slane %v1694_v37, %v1698_v57 }
 0x1ad   :  { %v1131_v21 = vsel %vm1130_vm10, %v1122_v36, 0.0  ;;  %v794_v11 = vsel %vm742_vm2, %v793_v56, %v789_v0 }
 0x1ae   :  { %v1708_v24 = vpop.xlane.xlu0 %420 }
 0x1af   :  { %v798_v55 = vrot.slane %v1708_v24, %v1705_v28 }
 0x1b1   :  { %v799_v54 = vsel %vm749_vm3, %v798_v55, %v794_v11 }
 0x1b8   :  { %v1723_v17 = vpop.xlane.xlu0 %441 }
 0x1b9   :  { %v1731_v52 = vpop.xlane.xlu1 %438  ;;  %v832_v60 = vrot.slane %v1723_v17, %v1701_v26 }
 0x1ba   :  { %v828_v27 = vrot.slane %v1731_v52, %v1698_v57 }
 0x1bc   :  { %v1738_v15 = vpop.xlane.xlu0 %444  ;;  %v833_v0 = vsel %vm742_vm2, %v832_v60, %v828_v27 }
 0x1bd   :  { %v424_v42 = vpop.xlane.xlu1 %423  ;;  %v837_v36 = vrot.slane %v1738_v15, %v1705_v28 }
 0x1be   :  { %v803_v8 = vrot.slane %v424_v42, %v1713_v58  ;;  %v1229_v42 = vsel %vm646_vm11, 1.0, %v1263_v18 }
 0x1bf   :  { %v838_v52 = vsel %vm749_vm3, %v837_v36, %v833_v0  ;;  %v1231_v0 = vsel %vm648_vm13, 1.0, %v1263_v18 }
 0x1c0   :  { %v804_v37 = vsel %vm756_vm4, %v803_v8, %v799_v54 }
 0x1c1   :  { %v1749_v12 = vpop.xlane.xlu1 %462  ;;  %v1751_v49 = vpop.xlane.xlu0 %465 }
 0x1c2   :  { %v867_v32 = vrot.slane %v1749_v12, %v1698_v57 }
 0x1c5   :  { %v427_v3 = vpop.xlane.xlu1 %426  ;;  %v448_v46 = vpop.xlane.xlu0 %447 }
 0x1c6   :  { %v808_v9 = vrot.slane %v427_v3, %v1720_v29 }
 0x1c8   :  { %v809_v24 = vsel %vm763_vm5, %v808_v9, %v804_v37 }
 0x1c9   :  { %v1758_v22 = vpop.xlane.xlu1 %468  ;;  %v1760_v39 = vpop.xlane.xlu0 %486 }
 0x1ca   :  { %v906_v33 = vrot.slane %v1760_v39, %v1698_v57 }
 0x1cd   :  { %v1763_v40 = vpop.xlane.xlu1 %489  ;;  %1132 = vadd.xlane.f32.xlu1 %v1131_v21  ;;  %v430_v47 = vpop.xlane.xlu0 %429  ;;  %v842_v21 = vrot.slane %v448_v46, %v1713_v58 }
 0x1ce   :  { %v813_v38 = vrot.slane %v430_v47, %v1728_v62  ;;  %v910_v60 = vrot.slane %v1763_v40, %v1701_v26 }
 0x1cf   :  { %v843_v17 = vsel %vm756_vm4, %v842_v21, %v838_v52 }
 0x1d0   :  { %v814_v43 = vsel %vm770_vm6, %v813_v38, %v809_v24 }
 0x1d1   :  { %v451_v1 = vpop.xlane.xlu1 %450  ;;  %v1765_v31 = vpop.xlane.xlu0 %471 }
 0x1d2   :  { %v847_v47 = vrot.slane %v451_v1, %v1720_v29 }
 0x1d4   :  { %v848_v15 = vsel %vm763_vm5, %v847_v47, %v843_v17 }
 0x1d5   :  { %v1767_v61 = vpop.xlane.xlu1 %492  ;;  %v1769_v50 = vpop.xlane.xlu0 %510 }
 0x1d6   :  { %v915_v21 = vrot.slane %v1767_v61, %v1705_v28  ;;  %v911_v61 = vsel %vm742_vm2, %v910_v60, %v906_v33  ;;  %v945_v34 = vrot.slane %v1769_v50, %v1698_v57 }
 0x1d9   :  { %v1771_v5 = vpop.xlane.xlu1 %513  ;;  %v433_v2 = vpop.xlane.xlu0 %432 }
 0x1da   :  { %v818_v25 = vrot.slane %v433_v2, %v1736_v44 }
 0x1dc   :  { %v819_v4 = vsel %vm777_vm7, %v818_v25, %v814_v43 }
 0x1dd   :  { %v454_v41 = vpop.xlane.xlu1 %453  ;;  %v1773_v51 = vpop.xlane.xlu0 %474 }
 0x1de   :  { %v852_v55 = vrot.slane %v454_v41, %v1728_v62  ;;  %v1230_v41 = vsel %vm647_vm12, 1.0, %v1263_v18 }
 0x1e0   :  { %v853_v9 = vsel %vm770_vm6, %v852_v55, %v848_v15 }
 0x1e1   :  { %v1775_v20 = vpop.xlane.xlu1 %495  ;;  %v1777_v53 = vpop.xlane.xlu0 %516 }
 0x1e2   :  { %v920_v55 = vrot.slane %v1775_v20, %v1713_v58 }
 0x1e5   :  { %v1787_v59 = vpop.xlane.xlu1 %534  ;;  %v1789_v10 = vpop.xlane.xlu0 %537 }
 0x1e9   :  { %v436_v19 = vpop.xlane.xlu1 %435  ;;  %v457_v63 = vpop.xlane.xlu0 %456 }
 0x1ea   :  { %v823_v48 = vrot.slane %v436_v19, %v1743_v14  ;;  %v857_v8 = vrot.slane %v457_v63, %v1736_v44  ;;  %v871_v19 = vrot.slane %v1751_v49, %v1701_v26  ;;  %v876_v63 = vrot.slane %v1758_v22, %v1705_v28 }
 0x1ec   :  { %v824_v6 = vsel %vm784_vm8, %v823_v48, %v819_v4  ;;  %v858_v38 = vsel %vm777_vm7, %v857_v8, %v853_v9  ;;  %v881_v48 = vrot.slane %v1765_v31, %v1713_v58  ;;  %v886_v4 = vrot.slane %v1773_v51, %v1720_v29 }
 0x1ed   :  { %v478_v7 = vpop.xlane.xlu1 %477  ;;  %v1804_v23 = vpop.xlane.xlu0 %498  ;;  %v1123_v45 = vmul.f32 %v1229_v42, %v824_v6  ;;  %v872_v12 = vsel %vm742_vm2, %v871_v19, %v867_v32  ;;  %v1232_v19 = vsel %vm649_vm14, 1.0, %v1263_v18 }
 0x1ee   :  { %v891_v49 = vrot.slane %v478_v7, %v1728_v62  ;;  %v925_v40 = vrot.slane %v1804_v23, %v1720_v29 }
 0x1ef   :  { %v1134_v30 = vsel %vm1130_vm10, %v1123_v45, 0.0  ;;  %v877_v45 = vsel %vm749_vm3, %v876_v63, %v872_v12 }
 0x1f0   :  { %1135 = vadd.xlane.f32.xlu0 %v1134_v30  ;;  %v882_v30 = vsel %vm756_vm4, %v881_v48, %v877_v45 }
 0x1f1   :  { %v1807_v13 = vpop.xlane.xlu1 %519  ;;  %v1809_v3 = vpop.xlane.xlu0 %540  ;;  %v887_v31 = vsel %vm763_vm5, %v886_v4, %v882_v30 }
 0x1f2   :  { %v892_v36 = vsel %vm770_vm6, %v891_v49, %v887_v31  ;;  %v959_v63 = vrot.slane %v1807_v13, %v1713_v58 }
 0x1f5   :  { %v1819_v2 = vpop.xlane.xlu1 %558  ;;  %v1821_v56 = vpop.xlane.xlu0 %561 }
 0x1f6   :  { %v1023_v35 = vrot.slane %v1819_v2, %v1698_v57  ;;  %v1027_v33 = vrot.slane %v1821_v56, %v1701_v26  ;;  %v993_v2 = vrot.slane %v1809_v3, %v1705_v28 }
 0x1f9   :  { %v460_v46 = vpop.xlane.xlu1 %459  ;;  %v481_v1 = vpop.xlane.xlu0 %480 }
 0x1fa   :  { %v862_v11 = vrot.slane %v460_v46, %v1743_v14  ;;  %v896_v22 = vrot.slane %v481_v1, %v1736_v44  ;;  %v916_v1 = vsel %vm749_vm3, %v915_v21, %v911_v61 }
 0x1fb   :  { %v921_v20 = vsel %vm756_vm4, %v920_v55, %v916_v1 }
 0x1fc   :  { %v863_v54 = vsel %vm784_vm8, %v862_v11, %v858_v38  ;;  %v897_v47 = vsel %vm777_vm7, %v896_v22, %v892_v36  ;;  %v926_v23 = vsel %vm763_vm5, %v925_v40, %v921_v20  ;;  %v1233_v36 = vsel %vm650_vm15, 1.0, %v1263_v18 }
 0x1fd   :  { %v502_v25 = vpop.xlane.xlu1 %501  ;;  %v1836_v37 = vpop.xlane.xlu0 %522  ;;  %v1124_v24 = vmul.f32 %v1230_v41, %v863_v54  ;;  %v949_v41 = vrot.slane %v1771_v5, %v1701_v26  ;;  %v984_v40 = vrot.slane %v1787_v59, %v1698_v57 }
 0x1fe   :  { %v930_v46 = vrot.slane %v502_v25, %v1728_v62  ;;  %v964_v5 = vrot.slane %v1836_v37, %v1720_v29 }
 0x1ff   :  { %v1137_v43 = vsel %vm1130_vm10, %v1124_v24, 0.0  ;;  %v954_v24 = vrot.slane %v1777_v53, %v1705_v28  ;;  %v950_v53 = vsel %vm742_vm2, %v949_v41, %v945_v34 }
 0x200   :  { %1138 = vadd.xlane.f32.xlu0 %v1137_v43  ;;  %v931_v54 = vsel %vm770_vm6, %v930_v46, %v926_v23 }
 0x201   :  { %v1849_v42 = vpop.xlane.xlu1 %543  ;;  %v1851_v6 = vpop.xlane.xlu0 %564  ;;  %v955_v45 = vsel %vm749_vm3, %v954_v24, %v950_v53 }
 0x202   :  { %v960_v13 = vsel %vm756_vm4, %v959_v63, %v955_v45  ;;  %v1032_v55 = vrot.slane %v1851_v6, %v1705_v28  ;;  %v1028_v6 = vsel %vm742_vm2, %v1027_v33, %v1023_v35  ;;  %v998_v59 = vrot.slane %v1849_v42, %v1713_v58 }
 0x203   :  { %v965_v37 = vsel %vm763_vm5, %v964_v5, %v960_v13 }
 0x205   :  { %v484_v51 = vpop.xlane.xlu1 %483  ;;  %v505_v27 = vpop.xlane.xlu0 %504 }
 0x206   :  { %v901_v7 = vrot.slane %v484_v51, %v1743_v14  ;;  %v935_v39 = vrot.slane %v505_v27, %v1736_v44 }
 0x208   :  { %v902_v52 = vsel %vm784_vm8, %v901_v7, %v897_v47  ;;  %v936_v32 = vsel %vm777_vm7, %v935_v39, %v931_v54  ;;  %v1033_v39 = vsel %vm749_vm3, %v1032_v55, %v1028_v6 }
 0x209   :  { %v526_v8 = vpop.xlane.xlu1 %525  ;;  %v1876_v17 = vpop.xlane.xlu0 %546  ;;  %v1125_v15 = vmul.f32 %v1231_v0, %v902_v52 }
 0x20a   :  { %v969_v49 = vrot.slane %v526_v8, %v1728_v62  ;;  %v988_v8 = vrot.slane %v1789_v10, %v1701_v26  ;;  %v1003_v28 = vrot.slane %v1876_v17, %v1720_v29 }
 0x20b   :  { %v1140_v9 = vsel %vm1130_vm10, %v1125_v15, 0.0 }
 0x20c   :  { %1141 = vadd.xlane.f32.xlu1 %v1140_v9  ;;  %v970_v51 = vsel %vm770_vm6, %v969_v49, %v965_v37  ;;  %v989_v10 = vsel %vm742_vm2, %v988_v8, %v984_v40  ;;  %vm1059_vm2 = vcmask 1041409  }
 0x20d   :  { %v568_v11 = vpop.xlane.xlu1 %567  ;;  %v508_v38 = vpop.xlane.xlu0 %507  ;;  %v994_v9 = vsel %vm749_vm3, %v993_v2, %v989_v10  ;;  %vm1060_vm3 = vcmask 1042434  }
 0x20e   :  { %v940_v25 = vrot.slane %v508_v38, %v1743_v14  ;;  %v1037_v15 = vrot.slane %v568_v11, %v1713_v58 }
 0x210   :  { %v941_v43 = vsel %vm784_vm8, %v940_v25, %v936_v32  ;;  %v1038_v3 = vsel %vm756_vm4, %v1037_v15, %v1033_v39 }
 0x211   :  { %v529_v48 = vpop.xlane.xlu1 %528  ;;  %v550_v4 = vpop.xlane.xlu0 %549  ;;  %v1126_v12 = vmul.f32 %v1232_v19, %v941_v43 }
 0x212   :  { %v974_v22 = vrot.slane %v529_v48, %v1736_v44  ;;  %v1008_v20 = vrot.slane %v550_v4, %v1728_v62 }
 0x213   :  { %v1143_v50 = vsel %vm1130_vm10, %v1126_v12, 0.0 }
 0x214   :  { %1144 = vadd.xlane.f32.xlu0 %v1143_v50  ;;  %v975_v60 = vsel %vm777_vm7, %v974_v22, %v970_v51 }
 0x215   :  { %v571_v30 = vpop.xlane.xlu1 %570  ;;  %v532_v31 = vpop.xlane.xlu0 %531 }
 0x216   :  { %v979_v27 = vrot.slane %v532_v31, %v1743_v14  ;;  %v1042_v61 = vrot.slane %v571_v30, %v1720_v29  ;;  %v999_v29 = vsel %vm756_vm4, %v998_v59, %v994_v9  ;;  %vm1062_vm4 = vcmask 1043459  }
 0x217   :  { %v1004_v25 = vsel %vm763_vm5, %v1003_v28, %v999_v29 }
 0x218   :  { %v980_v7 = vsel %vm784_vm8, %v979_v27, %v975_v60  ;;  %v1043_v23 = vsel %vm763_vm5, %v1042_v61, %v1038_v3  ;;  %vm1064_vm5 = vcmask 1044484  }
 0x219   :  { %v553_v21 = vpop.xlane.xlu1 %552  ;;  %v574_v47 = vpop.xlane.xlu0 %573  ;;  %v1127_v0 = vmul.f32 %v1233_v36, %v980_v7 }
 0x21a   :  { %v1047_v1 = vrot.slane %v574_v47, %v1728_v62  ;;  %v1013_v58 = vrot.slane %v553_v21, %v1736_v44 }
 0x21b   :  { %v1146_v52 = vsel %vm1130_vm10, %v1127_v0, 0.0 }
 0x21c   :  { %1147 = vadd.xlane.f32.xlu1 %v1146_v52  ;;  %v1048_v42 = vsel %vm770_vm6, %v1047_v1, %v1043_v23 }
 0x21d   :  { %v556_v56 = vpop.xlane.xlu1 %555  ;;  %v577_v46 = vpop.xlane.xlu0 %576 }
 0x21e   :  { %v1052_v26 = vrot.slane %v577_v46, %v1736_v44  ;;  %v1018_v17 = vrot.slane %v556_v56, %v1743_v14  ;;  %v1009_v44 = vsel %vm770_vm6, %v1008_v20, %v1004_v25  ;;  %vm1066_vm6 = vcmask 1045509  }
 0x21f   :  { %v1014_v34 = vsel %vm777_vm7, %v1013_v58, %v1009_v44 }
 0x220   :  { %v1053_v54 = vsel %vm777_vm7, %v1052_v26, %v1048_v42  ;;  %vm1068_vm7 = vcmask 1046534  }
 0x221   :  { %v580_v11 = vpop.xlane.xlu1 %579  ;;  %v644_v38 = vpop.permute.xlu0 %643 }
 0x222   :  { %v1057_v41 = vrot.slane %v580_v11, %v1743_v14  ;;  %vm652_vm0 = vcmp.eq.s32.totalorder %v1305_v16, %v644_v38  ;;  %v1019_v14 = vsel %vm784_vm8, %v1018_v17, %v1014_v34 }
 0x223   :  { %v1235_v62 = vsel %vm652_vm0, 1.0, %v1263_v18 }
 0x224   :  { %v1058_v24 = vsel %vm784_vm8, %v1057_v41, %v1053_v54  ;;  %vm1070_vm8 = vcmask 1047559  }
 0x225   :  { %v1129_v32 = vmul.f32 %v1235_v62, %v1058_v24  ;;  %v636_v19 = vpop.permute.xlu1 %635 }
 0x226   :  { %vm651_vm1 = vcmp.eq.s32.totalorder %v1305_v16, %v636_v19 }
 0x227   :  { %v1234_v63 = vsel %vm651_vm1, 1.0, %v1263_v18  ;;  %v1152_v43 = vsel %vm1130_vm10, %v1129_v32, 0.0 }
 0x228   :  { %v1128_v5 = vmul.f32 %v1234_v63, %v1019_v14  ;;  %1153 = vadd.xlane.f32.xlu1 %v1152_v43 }
 0x22a   :  { %v1149_v48 = vsel %vm1130_vm10, %v1128_v5, 0.0 }
 0x22b   :  { %1150 = vadd.xlane.f32.xlu0 %v1149_v48 }
 0x256   :  { %v1133_v12 = vpop.xlane.xlu1 %1132 }
 0x257   :  { %v1155_v16 = vmul.f32 10.0, %v1133_v12 }
 0x259   :  { %v1174_v60 = vrot.slane %v1155_v16, %v1698_v57 }
 0x279   :  { %v1136_v4 = vpop.xlane.xlu0 %1135 }
 0x27a   :  { %v1156_v45 = vmul.f32 10.0, %v1136_v4 }
 0x27c   :  { %v1178_v30 = vrot.slane %v1156_v45, %v1698_v57 }
 0x27e   :  { %v1203_v21 = vsel %vm1059_vm2, %v1178_v30, %v1174_v60 }
 0x289   :  { %v1139_v53 = vpop.xlane.xlu0 %1138 }
 0x28a   :  { %v1157_v50 = vmul.f32 10.0, %v1139_v53 }
 0x28c   :  { %v1182_v51 = vrot.slane %v1157_v50, %v1698_v57 }
 0x28e   :  { %v1204_v33 = vsel %vm1060_vm3, %v1182_v51, %v1203_v21 }
 0x295   :  { %v1142_v49 = vpop.xlane.xlu1 %1141 }
 0x296   :  { %v1158_v37 = vmul.f32 10.0, %v1142_v49 }
 0x298   :  { %v1186_v36 = vrot.slane %v1158_v37, %v1698_v57 }
 0x29a   :  { %v1205_v52 = vsel %vm1062_vm4, %v1186_v36, %v1204_v33 }
 0x29d   :  { %v1145_v22 = vpop.xlane.xlu0 %1144 }
 0x29e   :  { %v1159_v18 = vmul.f32 10.0, %v1145_v22 }
 0x2a0   :  { %v1190_v7 = vrot.slane %v1159_v18, %v1698_v57 }
 0x2a2   :  { %v1206_v40 = vsel %vm1064_vm5, %v1190_v7, %v1205_v52 }
 0x2a5   :  { %v1148_v13 = vpop.xlane.xlu1 %1147 }
 0x2a6   :  { %v1160_v31 = vmul.f32 10.0, %v1148_v13 }
 0x2a8   :  { %v1194_v47 = vrot.slane %v1160_v31, %v1698_v57 }
 0x2aa   :  { %v1207_v15 = vsel %vm1066_vm6, %v1194_v47, %v1206_v40 }
 0x2b1   :  { %v1154_v27 = vpop.xlane.xlu1 %1153 }
 0x2b2   :  { %v1162_v0 = vmul.f32 10.0, %v1154_v27 }
 0x2b4   :  { %v1151_v35 = vpop.xlane.xlu0 %1150  ;;  %v1202_v2 = vrot.slane %v1162_v0, %v1698_v57 }
 0x2b5   :  { %v1161_v55 = vmul.f32 10.0, %v1151_v35 }
 0x2b7   :  { %v1198_v8 = vrot.slane %v1161_v55, %v1698_v57 }
 0x2b9   :  { %v1208_v61 = vsel %vm1068_vm7, %v1198_v8, %v1207_v15 }
 0x2ba   :  { %v1209_v56 = vsel %vm1070_vm8, %v1202_v2, %v1208_v61 }
 0x2bb   :  { %1212 = vst.msk [vmem:[#allocation2] sm:$0xff] %vm1211_vm9, %v1209_v56 }
 0x2bc   :  { %1251 = shalt.err (!%p1248_p4)
}
 0x2bd   :  { %1222 = dma.vmem_to_hbm [thread:$0]  %s1220_s9, 128, %s1975_s3, [#allocation3]  }
 0x2be   :  { %1260 = dma.done.wait [#allocation3], 128  }
 0x2bf   :  { %1261 = vsyncadd [#allocation3], 4294967168 }
 0x2c0   :  { %1226 = vsyncpa [#allocation3], 1 }

</bundles_post_ra>
